<compile_context>
chip_gen: v7x
topology: tpu7x:2x2x1
jax: 0.10.0
libtpu: 0.0.40
codegen_flags: <defaults>
</compile_context>

<pallas_src>
import functools

import jax
import jax.numpy as jnp
from jax import lax
from jax.experimental import pallas as pl
from jax.experimental.pallas import tpu as pltpu


def _round_up(v, m):
    return ((v + m - 1) // m) * m


def _pick_row_tile(n, max_tm=256):
    """Largest row tile <= max_tm that divides n and is a multiple of 8."""
    cap = min(max_tm, n)
    tm = cap - (cap % 8)
    while tm >= 8:
        if n % tm == 0:
            return tm
        tm -= 8
    return n  # fall back to the full (un-tiled) row dimension


# ---------------------------------------------------------------------------
# Kernel 1: linear projection + per-node attention coefficients (hoisted).
# ---------------------------------------------------------------------------
def gat_project_kernel(x_ref, w_ref, asrc_ref, adst_ref,
                       xp_ref, s_ref, d_ref, *, heads, out_ch):
    # xp = x @ W  (single pass over the rows; not recomputed per attention tile)
    xp = jnp.dot(x_ref[...].astype(jnp.float32), w_ref[...],
                 preferred_element_type=jnp.float32)          # [tm, H*C]
    xp_ref[...] = xp.astype(xp_ref.dtype)                     # bf16 for the MXU later

    asrc = asrc_ref[...]                                      # [H, C]
    adst = adst_ref[...]                                      # [H, C]
    for h in range(heads):
        xph = xp[:, h * out_ch:(h + 1) * out_ch]              # [tm, C]
        # VPU broadcast-multiply + lane reduction (no tiny MXU matmuls).
        s_ref[:, h:h + 1] = jnp.sum(xph * asrc[h:h + 1, :], axis=1, keepdims=True)
        d_ref[:, h:h + 1] = jnp.sum(xph * adst[h:h + 1, :], axis=1, keepdims=True)


# ---------------------------------------------------------------------------
# Kernel 2: masked attention softmax + aggregation, tiled over destination rows.
# ---------------------------------------------------------------------------
def gat_attn_kernel(adj_ref, xp_ref, st_ref, d_ref, bias_ref, out_ref, *,
                    heads, out_ch, activation, n_valid=None,
                    negative_slope=0.2):
    neg_big = jnp.float32(-1e30)

    adj = adj_ref[...]                    # [tm, N] bf16
    edge_mask = adj > 0                   # bool
    xp = xp_ref[...]                      # [N, H*C] bf16 (resident across tiles)
    bias = bias_ref[...]                  # [1, H*C] f32

    for h in range(heads):
        sl = slice(h * out_ch, (h + 1) * out_ch)

        s_row = st_ref[h:h + 1, :]        # [1, N]  alpha_src over source nodes
        d_col = d_ref[:, h:h + 1]         # [tm, 1] alpha_dst for this row tile

        # e[i, j] = leaky_relu(alpha_src[j] + alpha_dst[i]), masked by adjacency.
        e = d_col + s_row                                   # [tm, N] f32
        e = jnp.where(e > 0, e, negative_slope * e)
        e = jnp.where(edge_mask, e, neg_big)

        # Row softmax over incoming edges.  exp(-1e30 - m) == 0, so masked
        # entries vanish without an extra *adj multiply.
        m = jnp.max(e, axis=1, keepdims=True)
        p = jnp.exp(e - m)
        denom = jnp.sum(p, axis=1, keepdims=True)           # [tm, 1]
        alpha = p * pl.reciprocal(denom, approx=True)       # EUP recip, not VALU div

        # Weighted aggregation on the MXU: bf16 inputs, f32 accumulation.
        oh = jnp.dot(alpha.astype(jnp.bfloat16), xp[:, sl],
                     preferred_element_type=jnp.float32)     # [tm, C]
        oh = oh + bias[:, sl]

        if activation == "elu":
            oh = jnp.where(oh > 0, oh, jnp.exp(jnp.minimum(oh, 0.0)) - 1.0)
        elif activation == "log_softmax":
            # heads == 1 here; mask lane-padded (fake) classes before softmax.
            col = lax.broadcasted_iota(jnp.int32, oh.shape, 1)
            oh = jnp.where(col < n_valid, oh, neg_big)
            mm = jnp.max(oh, axis=1, keepdims=True)
            lse = mm + jnp.log(jnp.sum(jnp.exp(oh - mm), axis=1, keepdims=True))
            oh = oh - lse

        # Write this head's slice directly (no concat / extra copy).
        out_ref[:, sl] = oh.astype(out_ref.dtype)


# ---------------------------------------------------------------------------
# One GATConv layer = projection kernel + attention kernel.
# ---------------------------------------------------------------------------
def gat_conv(x, w, att_src, att_dst, adj, bias, *, heads, out_ch, activation,
             n_valid_out=None, row_tile=256):
    n, f_in = x.shape
    hc = heads * out_ch
    tm = _pick_row_tile(n, row_tile)
    grid = (n // tm,)
    cparams = pltpu.CompilerParams(dimension_semantics=("parallel",))

    if activation == "log_softmax":
        assert heads == 1 and n_valid_out is not None

    # ---- projection + attention coefficients (hoisted out of the attention
    #      loop so they are computed exactly once) ----
    xp, s, d = pl.pallas_call(
        functools.partial(gat_project_kernel, heads=heads, out_ch=out_ch),
        grid=grid,
        in_specs=[pl.BlockSpec((tm, f_in), lambda i: (i, 0)),
                  pl.BlockSpec((f_in, hc), lambda i: (0, 0)),
                  pl.BlockSpec((heads, out_ch), lambda i: (0, 0)),
                  pl.BlockSpec((heads, out_ch), lambda i: (0, 0))],
        out_specs=(pl.BlockSpec((tm, hc), lambda i: (i, 0)),
                   pl.BlockSpec((tm, heads), lambda i: (i, 0)),
                   pl.BlockSpec((tm, heads), lambda i: (i, 0))),
        out_shape=(jax.ShapeDtypeStruct((n, hc), jnp.bfloat16),
                   jax.ShapeDtypeStruct((n, heads), jnp.float32),
                   jax.ShapeDtypeStruct((n, heads), jnp.float32)),
        compiler_params=cparams,
    )(x, w, att_src, att_dst)

    # Tiny [N, H] -> [H, N] transpose so alpha_src broadcasts along lanes.
    st = s.T

    n_valid = n_valid_out if n_valid_out is not None else hc

    out = pl.pallas_call(
        functools.partial(gat_attn_kernel, heads=heads, out_ch=out_ch,
                          activation=activation, n_valid=n_valid),
        grid=grid,
        in_specs=[pl.BlockSpec((tm, n), lambda i: (i, 0)),      # adj row tile
                  pl.BlockSpec((n, hc), lambda i: (0, 0)),      # xp, resident
                  pl.BlockSpec((heads, n), lambda i: (0, 0)),   # alpha_src^T
                  pl.BlockSpec((tm, heads), lambda i: (i, 0)),  # alpha_dst tile
                  pl.BlockSpec((1, hc), lambda i: (0, 0))],     # bias
        out_specs=pl.BlockSpec((tm, hc), lambda i: (i, 0)),
        out_shape=jax.ShapeDtypeStruct((n, hc), jnp.float32),
        compiler_params=cparams,
    )(adj, xp, st, d, bias.reshape(1, hc))
    return out


def gat_forward(x, adj, params, *, row_tile=256):
    heads = params["heads"]
    hidden = params["hidden"]
    nc = params["n_classes"]

    # conv1 -> ELU (fused into the attention kernel epilogue)
    h = gat_conv(x, params["w1"], params["as1"], params["ad1"], adj,
                 params["b1"], heads=heads, out_ch=hidden, activation="elu",
                 row_tile=row_tile)

    # TODO(synk): dropout is a no-op here since the module uses dropout=0.0.

    # conv2 -> log_softmax.  Pad the class dimension to 128 lanes so the
    # output stores are lane-dense; padded columns are masked inside the
    # kernel and sliced off here.
    cp = _round_up(max(nc, 128), 128)
    w2 = jnp.zeros((params["w2"].shape[0], cp), jnp.float32).at[:, :nc].set(params["w2"])
    as2 = jnp.zeros((1, cp), jnp.float32).at[:, :nc].set(params["as2"])
    ad2 = jnp.zeros((1, cp), jnp.float32).at[:, :nc].set(params["ad2"])
    b2 = jnp.zeros((cp,), jnp.float32).at[:nc].set(params["b2"])

    out_padded = gat_conv(h, w2, as2, ad2, adj, b2, heads=1, out_ch=cp,
                          activation="log_softmax", n_valid_out=nc,
                          row_tile=row_tile)
    return out_padded[:, :nc]


def build_dense_adj(edge_index, n, dtype=jnp.bfloat16):
    """adj[i, j] = 1 if edge j -> i exists; self-loops added (GATConv default)."""
    src, dst = edge_index[0], edge_index[1]
    adj = jnp.zeros((n, n), jnp.float32).at[dst, src].set(1.0)
    adj = adj.at[jnp.arange(n), jnp.arange(n)].set(1.0)   # self loops
    return adj.astype(dtype)


if __name__ == "__main__":
    N = 64            # number of nodes
    F_IN = 8          # n_features
    HIDDEN = 16       # hidden_dim
    HEADS = 4         # n_heads
    N_CLASSES = 4     # n_classes

    key = jax.random.PRNGKey(0)
    keys = jax.random.split(key, 8)

    # Node features.
    x = jax.random.normal(keys[0], (N, F_IN), jnp.float32)

    # Ring graph (bidirectional) as edge_index [2, E].
    idx = jnp.arange(N)
    src = jnp.concatenate([idx, (idx + 1) % N])
    dst = jnp.concatenate([(idx + 1) % N, idx])
    edge_index = jnp.stack([src, dst])            # [2, 2N]
    adj = build_dense_adj(edge_index, N)          # bf16 dense adjacency

    # Deterministic synthetic parameters (shapes match GATConv internals).
    params = {
        "heads": HEADS, "hidden": HIDDEN, "n_classes": N_CLASSES,
        # conv1: GATConv(F_IN, HIDDEN, heads=HEADS)
        "w1":  jax.random.normal(keys[1], (F_IN, HEADS * HIDDEN), jnp.float32) * 0.1,
        "as1": jax.random.normal(keys[2], (HEADS, HIDDEN), jnp.float32) * 0.1,
        "ad1": jax.random.normal(keys[3], (HEADS, HIDDEN), jnp.float32) * 0.1,
        "b1":  jnp.zeros((HEADS * HIDDEN,), jnp.float32),
        # conv2: GATConv(HIDDEN*HEADS, N_CLASSES, heads=1)
        "w2":  jax.random.normal(keys[4], (HEADS * HIDDEN, N_CLASSES), jnp.float32) * 0.1,
        "as2": jax.random.normal(keys[5], (1, N_CLASSES), jnp.float32) * 0.1,
        "ad2": jax.random.normal(keys[6], (1, N_CLASSES), jnp.float32) * 0.1,
        "b2":  jnp.zeros((N_CLASSES,), jnp.float32),
    }

    # row_tile=32 -> grid of 2 row tiles (exercises the tiled / pipelined path).
    out = jax.block_until_ready(gat_forward(x, adj, params, row_tile=32))

    assert out.shape == (N, N_CLASSES)
    assert bool(jnp.all(jnp.isfinite(out)))
    # log_softmax rows should exp-sum to ~1
    assert bool(jnp.allclose(jnp.sum(jnp.exp(out), axis=1), 1.0, atol=1e-4))
    print("KERNEL_OK")
</pallas_src>

<mosaic_0001>
module attributes {stable_mosaic.version = 11 : i64} {
  func.func @gat_project_kernel(%arg0: i32, %arg1: memref<32x8xf32, #tpu.memory_space<vmem>>, %arg2: memref<8x64xf32, #tpu.memory_space<vmem>>, %arg3: memref<4x16xf32, #tpu.memory_space<vmem>>, %arg4: memref<4x16xf32, #tpu.memory_space<vmem>>, %arg5: memref<32x64xbf16, #tpu.memory_space<vmem>>, %arg6: memref<32x4xf32, #tpu.memory_space<vmem>>, %arg7: memref<32x4xf32, #tpu.memory_space<vmem>>) attributes {dimension_semantics = [#tpu.dimension_semantics<parallel>], iteration_bounds = array<i64: 2>, scalar_prefetch = 0 : i64, scratch_operands = 0 : i64, tpu.core_type = #tpu.core_type<tc>, window_params = [{transform_indices = @transform_0, window_bounds = array<i64: 32, 8>}, {pipeline_mode = #tpu.pipeline_mode<synchronous>, transform_indices = @transform_1, window_bounds = array<i64: 8, 64>}, {pipeline_mode = #tpu.pipeline_mode<synchronous>, transform_indices = @transform_2, window_bounds = array<i64: 4, 16>}, {pipeline_mode = #tpu.pipeline_mode<synchronous>, transform_indices = @transform_3, window_bounds = array<i64: 4, 16>}, {transform_indices = @transform_4, window_bounds = array<i64: 32, 64>}, {transform_indices = @transform_5, window_bounds = array<i64: 32, 4>}, {transform_indices = @transform_6, window_bounds = array<i64: 32, 4>}]} {
    %c0 = arith.constant 0 : index
    %c0_0 = arith.constant 0 : index
    %0 = vector.load %arg1[%c0, %c0_0] : memref<32x8xf32, #tpu.memory_space<vmem>>, vector<32x8xf32>
    %c0_1 = arith.constant 0 : index
    %c0_2 = arith.constant 0 : index
    %1 = vector.load %arg2[%c0_1, %c0_2] : memref<8x64xf32, #tpu.memory_space<vmem>>, vector<8x64xf32>
    %cst = arith.constant dense<0.000000e+00> : vector<32x64xf32>
    %2 = tpu.matmul %0, %1, %cst {dimension_numbers = #tpu.dot_dimension_numbers<[1], [0], [0], [1], [0, 0, 1, 1], [], []>} : vector<32x8xf32>, vector<8x64xf32>, vector<32x64xf32> -> vector<32x64xf32>
    %3 = arith.truncf %2 : vector<32x64xf32> to vector<32x64xbf16>
    %c0_3 = arith.constant 0 : index
    %c0_4 = arith.constant 0 : index
    %4 = vector.load %arg5[%c0_3, %c0_4] : memref<32x64xbf16, #tpu.memory_space<vmem>>, vector<32x64xbf16>
    tpu.vector_store %arg5[%c0_3, %c0_4], %3 {strides = array<i32>} : memref<32x64xbf16, #tpu.memory_space<vmem>>, vector<32x64xbf16>,
    %c0_5 = arith.constant 0 : index
    %c0_6 = arith.constant 0 : index
    %5 = vector.load %arg3[%c0_5, %c0_6] : memref<4x16xf32, #tpu.memory_space<vmem>>, vector<4x16xf32>
    %c0_7 = arith.constant 0 : index
    %c0_8 = arith.constant 0 : index
    %6 = vector.load %arg4[%c0_7, %c0_8] : memref<4x16xf32, #tpu.memory_space<vmem>>, vector<4x16xf32>
    %7 = vector.extract_strided_slice %2 {offsets = [0, 0], sizes = [32, 16], strides = [1, 1]} : vector<32x64xf32> to vector<32x16xf32>
    %8 = vector.extract_strided_slice %5 {offsets = [0, 0], sizes = [1, 16], strides = [1, 1]} : vector<4x16xf32> to vector<1x16xf32>
    %9 = vector.broadcast %8 : vector<1x16xf32> to vector<32x16xf32>
    %10 = arith.mulf %7, %9 : vector<32x16xf32>
    %cst_9 = arith.constant dense<0.000000e+00> : vector<32xf32>
    %11 = vector.multi_reduction <add>, %10, %cst_9 [1] : vector<32x16xf32> to vector<32xf32>
    %12 = vector.shape_cast %11 : vector<32xf32> to vector<32x1xf32>
    %c0_10 = arith.constant 0 : index
    %c0_11 = arith.constant 0 : index
    %13 = vector.load %arg6[%c0_10, %c0_11] : memref<32x4xf32, #tpu.memory_space<vmem>>, vector<32x1xf32>
    tpu.vector_store %arg6[%c0_10, %c0_11], %12 {strides = array<i32>} : memref<32x4xf32, #tpu.memory_space<vmem>>, vector<32x1xf32>,
    %14 = vector.extract_strided_slice %6 {offsets = [0, 0], sizes = [1, 16], strides = [1, 1]} : vector<4x16xf32> to vector<1x16xf32>
    %15 = vector.broadcast %14 : vector<1x16xf32> to vector<32x16xf32>
    %16 = arith.mulf %7, %15 : vector<32x16xf32>
    %cst_12 = arith.constant dense<0.000000e+00> : vector<32xf32>
    %17 = vector.multi_reduction <add>, %16, %cst_12 [1] : vector<32x16xf32> to vector<32xf32>
    %18 = vector.shape_cast %17 : vector<32xf32> to vector<32x1xf32>
    %c0_13 = arith.constant 0 : index
    %c0_14 = arith.constant 0 : index
    %19 = vector.load %arg7[%c0_13, %c0_14] : memref<32x4xf32, #tpu.memory_space<vmem>>, vector<32x1xf32>
    tpu.vector_store %arg7[%c0_13, %c0_14], %18 {strides = array<i32>} : memref<32x4xf32, #tpu.memory_space<vmem>>, vector<32x1xf32>,
    %20 = vector.extract_strided_slice %2 {offsets = [0, 16], sizes = [32, 16], strides = [1, 1]} : vector<32x64xf32> to vector<32x16xf32>
    %21 = vector.extract_strided_slice %5 {offsets = [1, 0], sizes = [1, 16], strides = [1, 1]} : vector<4x16xf32> to vector<1x16xf32>
    %22 = vector.broadcast %21 : vector<1x16xf32> to vector<32x16xf32>
    %23 = arith.mulf %20, %22 : vector<32x16xf32>
    %cst_15 = arith.constant dense<0.000000e+00> : vector<32xf32>
    %24 = vector.multi_reduction <add>, %23, %cst_15 [1] : vector<32x16xf32> to vector<32xf32>
    %25 = vector.shape_cast %24 : vector<32xf32> to vector<32x1xf32>
    %c0_16 = arith.constant 0 : index
    %c1 = arith.constant 1 : index
    %26 = vector.load %arg6[%c0_16, %c1] : memref<32x4xf32, #tpu.memory_space<vmem>>, vector<32x1xf32>
    tpu.vector_store %arg6[%c0_16, %c1], %25 {strides = array<i32>} : memref<32x4xf32, #tpu.memory_space<vmem>>, vector<32x1xf32>,
    %27 = vector.extract_strided_slice %6 {offsets = [1, 0], sizes = [1, 16], strides = [1, 1]} : vector<4x16xf32> to vector<1x16xf32>
    %28 = vector.broadcast %27 : vector<1x16xf32> to vector<32x16xf32>
    %29 = arith.mulf %20, %28 : vector<32x16xf32>
    %cst_17 = arith.constant dense<0.000000e+00> : vector<32xf32>
    %30 = vector.multi_reduction <add>, %29, %cst_17 [1] : vector<32x16xf32> to vector<32xf32>
    %31 = vector.shape_cast %30 : vector<32xf32> to vector<32x1xf32>
    %c0_18 = arith.constant 0 : index
    %c1_19 = arith.constant 1 : index
    %32 = vector.load %arg7[%c0_18, %c1_19] : memref<32x4xf32, #tpu.memory_space<vmem>>, vector<32x1xf32>
    tpu.vector_store %arg7[%c0_18, %c1_19], %31 {strides = array<i32>} : memref<32x4xf32, #tpu.memory_space<vmem>>, vector<32x1xf32>,
    %33 = vector.extract_strided_slice %2 {offsets = [0, 32], sizes = [32, 16], strides = [1, 1]} : vector<32x64xf32> to vector<32x16xf32>
    %34 = vector.extract_strided_slice %5 {offsets = [2, 0], sizes = [1, 16], strides = [1, 1]} : vector<4x16xf32> to vector<1x16xf32>
    %35 = vector.broadcast %34 : vector<1x16xf32> to vector<32x16xf32>
    %36 = arith.mulf %33, %35 : vector<32x16xf32>
    %cst_20 = arith.constant dense<0.000000e+00> : vector<32xf32>
    %37 = vector.multi_reduction <add>, %36, %cst_20 [1] : vector<32x16xf32> to vector<32xf32>
    %38 = vector.shape_cast %37 : vector<32xf32> to vector<32x1xf32>
    %c0_21 = arith.constant 0 : index
    %c2 = arith.constant 2 : index
    %39 = vector.load %arg6[%c0_21, %c2] : memref<32x4xf32, #tpu.memory_space<vmem>>, vector<32x1xf32>
    tpu.vector_store %arg6[%c0_21, %c2], %38 {strides = array<i32>} : memref<32x4xf32, #tpu.memory_space<vmem>>, vector<32x1xf32>,
    %40 = vector.extract_strided_slice %6 {offsets = [2, 0], sizes = [1, 16], strides = [1, 1]} : vector<4x16xf32> to vector<1x16xf32>
    %41 = vector.broadcast %40 : vector<1x16xf32> to vector<32x16xf32>
    %42 = arith.mulf %33, %41 : vector<32x16xf32>
    %cst_22 = arith.constant dense<0.000000e+00> : vector<32xf32>
    %43 = vector.multi_reduction <add>, %42, %cst_22 [1] : vector<32x16xf32> to vector<32xf32>
    %44 = vector.shape_cast %43 : vector<32xf32> to vector<32x1xf32>
    %c0_23 = arith.constant 0 : index
    %c2_24 = arith.constant 2 : index
    %45 = vector.load %arg7[%c0_23, %c2_24] : memref<32x4xf32, #tpu.memory_space<vmem>>, vector<32x1xf32>
    tpu.vector_store %arg7[%c0_23, %c2_24], %44 {strides = array<i32>} : memref<32x4xf32, #tpu.memory_space<vmem>>, vector<32x1xf32>,
    %46 = vector.extract_strided_slice %2 {offsets = [0, 48], sizes = [32, 16], strides = [1, 1]} : vector<32x64xf32> to vector<32x16xf32>
    %47 = vector.extract_strided_slice %5 {offsets = [3, 0], sizes = [1, 16], strides = [1, 1]} : vector<4x16xf32> to vector<1x16xf32>
    %48 = vector.broadcast %47 : vector<1x16xf32> to vector<32x16xf32>
    %49 = arith.mulf %46, %48 : vector<32x16xf32>
    %cst_25 = arith.constant dense<0.000000e+00> : vector<32xf32>
    %50 = vector.multi_reduction <add>, %49, %cst_25 [1] : vector<32x16xf32> to vector<32xf32>
    %51 = vector.shape_cast %50 : vector<32xf32> to vector<32x1xf32>
    %c0_26 = arith.constant 0 : index
    %c3 = arith.constant 3 : index
    %52 = vector.load %arg6[%c0_26, %c3] : memref<32x4xf32, #tpu.memory_space<vmem>>, vector<32x1xf32>
    tpu.vector_store %arg6[%c0_26, %c3], %51 {strides = array<i32>} : memref<32x4xf32, #tpu.memory_space<vmem>>, vector<32x1xf32>,
    %53 = vector.extract_strided_slice %6 {offsets = [3, 0], sizes = [1, 16], strides = [1, 1]} : vector<4x16xf32> to vector<1x16xf32>
    %54 = vector.broadcast %53 : vector<1x16xf32> to vector<32x16xf32>
    %55 = arith.mulf %46, %54 : vector<32x16xf32>
    %cst_27 = arith.constant dense<0.000000e+00> : vector<32xf32>
    %56 = vector.multi_reduction <add>, %55, %cst_27 [1] : vector<32x16xf32> to vector<32xf32>
    %57 = vector.shape_cast %56 : vector<32xf32> to vector<32x1xf32>
    %c0_28 = arith.constant 0 : index
    %c3_29 = arith.constant 3 : index
    %58 = vector.load %arg7[%c0_28, %c3_29] : memref<32x4xf32, #tpu.memory_space<vmem>>, vector<32x1xf32>
    tpu.vector_store %arg7[%c0_28, %c3_29], %57 {strides = array<i32>} : memref<32x4xf32, #tpu.memory_space<vmem>>, vector<32x1xf32>,
    return
  }
  func.func @transform_0(%arg0: i32) -> (i32, i32) {
    %c0_i32 = arith.constant 0 : i32
    %c0_i32_0 = arith.constant 0 : i32
    return %arg0, %c0_i32 : i32, i32
  }
  func.func @transform_1(%arg0: i32) -> (i32, i32) {
    %c0_i32 = arith.constant 0 : i32
    %c0_i32_0 = arith.constant 0 : i32
    %c0_i32_1 = arith.constant 0 : i32
    return %c0_i32, %c0_i32_0 : i32, i32
  }
  func.func @transform_2(%arg0: i32) -> (i32, i32) {
    %c0_i32 = arith.constant 0 : i32
    %c0_i32_0 = arith.constant 0 : i32
    %c0_i32_1 = arith.constant 0 : i32
    return %c0_i32, %c0_i32_0 : i32, i32
  }
  func.func @transform_3(%arg0: i32) -> (i32, i32) {
    %c0_i32 = arith.constant 0 : i32
    %c0_i32_0 = arith.constant 0 : i32
    %c0_i32_1 = arith.constant 0 : i32
    return %c0_i32, %c0_i32_0 : i32, i32
  }
  func.func @transform_4(%arg0: i32) -> (i32, i32) {
    %c0_i32 = arith.constant 0 : i32
    %c0_i32_0 = arith.constant 0 : i32
    return %arg0, %c0_i32 : i32, i32
  }
  func.func @transform_5(%arg0: i32) -> (i32, i32) {
    %c0_i32 = arith.constant 0 : i32
    %c0_i32_0 = arith.constant 0 : i32
    return %arg0, %c0_i32 : i32, i32
  }
  func.func @transform_6(%arg0: i32) -> (i32, i32) {
    %c0_i32 = arith.constant 0 : i32
    %c0_i32_0 = arith.constant 0 : i32
    return %arg0, %c0_i32 : i32, i32
  }
}

</mosaic_0001>

<bundles_post_ra>
// kernel: tpu_custom_call.1
= control target key start
LH: loop header
LB: loop body
LE: loop exit
PB: predicated region body
PF: predicated region fallthrough
CT: control target
= control target key end

     0   :  { %12 = vsyncpa [#allocation3], 0  ;;  %s1385_s0 = inlined_call_operand.vmem [shape: f32[64,8], index: 0, kind: input, shape index: {}]   ;;  %s1386_s1 = inlined_call_operand.vmem [shape: f32[8,64], index: 1, kind: input, shape index: {}]   ;;  %s1387_s2 = inlined_call_operand.vmem [shape: f32[4,16], index: 2, kind: input, shape index: {}]   ;;  %s1388_s3 = inlined_call_operand.vmem [shape: f32[4,16], index: 3, kind: input, shape index: {}]   ;;  %s1389_s4 = inlined_call_operand.hbm [shape: bf16[64,64], index: 4, kind: output, shape index: {0}]   ;;  %s1390_s5 = inlined_call_operand.vmem [shape: f32[64,4], index: 5, kind: output, shape index: {1}]   ;;  %s1391_s6 = inlined_call_operand.vmem [shape: f32[64,4], index: 6, kind: output, shape index: {2}]  }
   0x1   :  { %14 = vsyncpa [#allocation3 + $0x1], 0  ;;  %s1066_s21 = smov 0   ;;  %s1068_s22 = smov 0  }
   0x2   :  { %s1070_s23 = smov 0   ;;  %s1072_s24 = smov 0  }
   0x3 LB: > { %s1087_s25 = sadd.s32 4294967295, %s1020_s24   ;;  %s867_s26 = sadd.s32 4294967294, %s1020_s24   ;;  %s1020_s24 = sphi %s1072_s24, %s1397_s24   ;;  %s1016_s23 = sphi %s1070_s23, %s1396_s23   ;;  %s1012_s22 = sphi %s1068_s22, %s1395_s22   ;;  %s1008_s21 = sphi %s1066_s21, %s1394_s21  }
   0x4   : > { %s1091_s27 = sadd.s32 1, %s1020_s24   ;;  %s116_s28 = sadd.s32 1, %s1016_s23 }
   0x5   : > { %s113_s29 = ssub.s32 %s1020_s24, %s1091_s27  ;;  %p126_p0 = scmp.ne.s32.totalorder %s1016_s23, %s1012_s22 }
   0x6   : > { %p114_p1 = scmp.eq.s32.totalorder %s113_s29, 0  ;;  %p127_p2 = scmp.eq.s32.totalorder %s1087_s25, 1 }
   0x7   : > { %p132_p3 = scmp.ne.s32.totalorder %s1012_s22, %s1008_s21  ;;  %p133_p4 = scmp.eq.s32.totalorder %s867_s26, 1 }
   0x8   : > { %s1102_s30 = scalar_select %p114_p1, %s1016_s23, %s116_s28  }
   0x9   : > { %p1104_p5 = por %p127_p2, %p126_p0  ;;  %p1108_p6 = por %p133_p4, %p132_p3 }
   0xa   : > { %p870_p7 = scmp.ge.s32.totalorder %s1020_s24, 1  ;;  %p221_p8 = scmp.lt.s32.totalorder %s1020_s24, 3 }
   0xc   : > { %p222_p9 = pnand %p870_p7, %p221_p8 }
   0xd   : > { %v284_v0 = vld [vmem:[%s1386_s1] sm:$0xff] (!%p222_p9)  ;;  %s872_s11 = sshll.u32 (!%p222_p9), %s1087_s25, 2  ;;  %v406_v1 = vlaneseq (!%p222_p9)  ;;  %vm285_vm0 = vcmask (!%p222_p9), 64512   ;;  %s1022_s20 = smov (!%p222_p9), 16   ;;  %vm399_vm1 = vcmask (!%p222_p9), 519168   ;;  %vm414_vm2 = vcmask (!%p222_p9), 130048  }
   0xe   : > { %225 = sbr.rel (%p222_p9) target bundleno = 642 (0x282), region = 36  ;;  %901 = vmatprep.subr.mxu0 (!%p222_p9), %v284_v0  ;;  %909 = vmatprep.subr.mxu1 (!%p222_p9), %v284_v0  ;;  %p262_p10 = scmp.lt.s32.totalorder (!%p222_p9), %s872_s11, 7  ;;  %v405_v3 = vld [vmem:[%s1388_s3] sm:$0xf] (!%p222_p9)  ;;  %vm427_vm3 = vcmask (!%p222_p9), 7168  }
   0xf   : > { %902 = vmatpush3.msra.mxu0 (!%p222_p9), %v284_v0  ;;  %910 = vmatpush3.msra.mxu1 (!%p222_p9), %v284_v0  ;;  %v407_v2 = vshrl.u32 (!%p222_p9), %v406_v1, 7  ;;  %v404_v6 = vld [vmem:[%s1387_s2] sm:$0xf] (!%p222_p9)  ;;  %s1023_s26 = smov (!%p222_p9), 32   ;;  %s1024_s28 = smov (!%p222_p9), 48  }
  0x10   : > { %s244_s29 = sand.u32 (!%p222_p9), 1, %s1012_s22   ;;  %s1025_s10 = smov (!%p222_p9), 112  }
  0x11   : > { %v408_v4 = vsub.s32 (!%p222_p9), 0, %v407_v2  ;;  %v458_v5 = vsub.s32 (!%p222_p9), 1, %v407_v2  ;;  %v547_v9 = vsub.s32 (!%p222_p9), 2, %v407_v2  ;;  %v636_v16 = vsub.s32 (!%p222_p9), 3, %v407_v2  ;;  %s871_s9 = sshll.u32 (!%p222_p9), %s244_s29, 4  ;;  %s1026_s12 = smov (!%p222_p9), 80  }
  0x12   : > { %s1027_s13 = smov (!%p222_p9), 96  }
  0x13   : > { %v504_v7 = vrot.slane (!%p222_p9), %v405_v3, %v458_v5  ;;  %v435_v8 = vrot.slane (!%p222_p9), %v405_v3, %v408_v4  ;;  %v459_v13 = vrot.slane (!%p222_p9), %v404_v6, %v458_v5  ;;  %v593_v15 = vrot.slane (!%p222_p9), %v405_v3, %v547_v9 }
  0x14   : > { %v548_v17 = vrot.slane (!%p222_p9), %v404_v6, %v547_v9  ;;  %v637_v18 = vrot.slane (!%p222_p9), %v404_v6, %v636_v16  ;;  %v682_v19 = vrot.slane (!%p222_p9), %v405_v3, %v636_v16  ;;  %v409_v26 = vrot.slane (!%p222_p9), %v404_v6, %v408_v4 }
  0x15   : > { %s1399_s11 = smov (!%p262_p10, %s872_s11), 7  ;;  %506 = vrot.lane.b32.xlu1 %v504_v7, %s1022_s20  ;;  %461 = vrot.lane.b32.xlu0 %v459_v13, %s1022_s20 }
  0x16   : > { %s1124_s16 = sshll.u32 %s1399_s11, 3  ;;  %s1156_s11 = scalar_lea.vmem [#allocation2], %s871_s9 }
  0x17   : > { %s265_s19 = scalar_lea.vmem %s1385_s0, %s1124_s16  ;;  %s1258_s17 = scalar_lea.vmem %s1390_s5, %s1124_s16 }
  0x18   : > { %v280_v10 = vld [vmem:[%s265_s19] sm:$0xff]  ;;  %v282_v11 = vld [vmem:[%s265_s19 + $0x10] sm:$0xff]  ;;  %v281_v12 = vld [vmem:[%s265_s19 + $0x8] sm:$0xff]  ;;  %s1268_s20 = scalar_lea.vmem %s1391_s6, %s1124_s16  ;;  %s895_s16 = sshll.u32 %s1087_s25, 8 }
  0x19   : > { %903 = vmatprep.mubr.msk.f32.mxu0 %vm285_vm0, %v280_v10  ;;  %906 = vmatprep.mubr.msk.f32.mxu1 %vm285_vm0, %v282_v11  ;;  %v283_v14 = vld [vmem:[%s265_s19 + $0x18] sm:$0xff]  ;;  %s1292_s9 = scalar_lea.hbm %s1389_s4, %s895_s16  ;;  %s1028_s25 = smov [#allocation2]  }
  0x1a   : > { %904 = vmatmul.mubr.msk.f32.vlgmr.msra.gmra.mrb[0].mxu0 %vm285_vm0, %v281_v12  ;;  %907 = vmatmul.mubr.msk.f32.vlgmr.msra.gmra.mrb[0].mxu1 %vm285_vm0, %v283_v14  ;;  %s962_s14 = sshll.u32 %s1028_s25, 4  ;;  %s963_s14 = int_to_ptr.vmem [resolvable:$false] %s962_s14 }
  0x1b   : > { %595 = vrot.lane.b32.xlu1 %v593_v15, %s1023_s26  ;;  %550 = vrot.lane.b32.xlu0 %v548_v17, %s1023_s26  ;;  %s964_s15 = scalar_lea.vmem %s963_s14, 512 }
  0x1f   : > { %639 = vrot.lane.b32.xlu1 %v637_v18, %s1024_s28 }
  0x23   : > { %684 = vrot.lane.b32.xlu1 %v682_v19, %s1024_s28 }
  0x87   : > { %v507_v20 = vpop.permute.xlu1 %506  ;;  %v1137_v23 = vpop.permute.xlu0 %461 }
  0x8d   : > { %v1130_v21 = vpop.permute.xlu1 %595  ;;  %v551_v44 = vpop.permute.xlu0 %550 }
  0x91   : > { %v1133_v22 = vpop.permute.xlu1 %639 }
  0x95   : > { %v1148_v31 = vpop.permute.xlu1 %684 }
  0xed   : > { %v905_v24 = vpop.f32.mrb[0].mxu0  ;;  %v1139_v25 = vpop.f32.mrb[0].mxu1 }
  0xee   : > { %v1141_v27 = vpop.f32.mrb[1].mxu0  ;;  %v1143_v28 = vpop.f32.mrb[1].mxu1  ;;  %v467_v29 = vmul.f32 %v1139_v25, %v1137_v23  ;;  %v465_v30 = vmul.f32 %v905_v24, %v1137_v23  ;;  %v411_v34 = vmul.f32 %v905_v24, %v409_v26  ;;  %v688_v35 = vmul.f32 %v905_v24, %v1148_v31 }
  0xef   : > { %v891_v32 = vpack.c.bf16 %v1141_v27, %v1141_v27  ;;  %v893_v33 = vpack.c.bf16 %v1143_v28, %v1143_v28  ;;  %v510_v36 = vmul.f32 %v905_v24, %v507_v20  ;;  %v413_v37 = vmul.f32 %v1139_v25, %v409_v26 }
  0xf0   : > { %478 = vrot.lane.b32.xlu0 %v467_v29, %s1025_s10  ;;  %474 = vrot.lane.b32.xlu1 %v465_v30, %s1025_s10  ;;  %v437_v38 = vmul.f32 %v905_v24, %v435_v8  ;;  %v439_v39 = vmul.f32 %v1139_v25, %v435_v8  ;;  %v410_v40 = vmul.f32 %v409_v26, %v1141_v27  ;;  %v418_v54 = vsel %vm414_vm2, %v411_v34, 0.0 }
  0xf1   : > { %400 = vst.msk [vmem:[%s1156_s11] sm:$0xf] %vm399_vm1, %v891_v32  ;;  %402 = vst.msk [vmem:[%s1156_s11 + $0x8] sm:$0xf] %vm399_vm1, %v893_v33  ;;  %v436_v41 = vmul.f32 %v435_v8, %v1141_v27  ;;  %v438_v42 = vmul.f32 %v435_v8, %v1143_v28  ;;  %v512_v43 = vmul.f32 %v1139_v25, %v507_v20  ;;  %v424_v58 = vsel %vm414_vm2, %v413_v37, 0.0 }
  0xf2   : > { %v1173_v45 = vmul.f32 %v409_v26, %v1143_v28  ;;  %v892_v46 = vpack.c.bf16 %v905_v24, %v905_v24  ;;  %v894_v47 = vpack.c.bf16 %v1139_v25, %v1139_v25  ;;  %v554_v48 = vmul.f32 %v905_v24, %v551_v44 }
  0xf3   : > { %v556_v49 = vmul.f32 %v1139_v25, %v551_v44  ;;  %v599_v50 = vmul.f32 %v905_v24, %v1130_v21  ;;  %v601_v51 = vmul.f32 %v1139_v25, %v1130_v21  ;;  %v643_v52 = vmul.f32 %v905_v24, %v1133_v22 }
  0xf4   : > { %697 = vrot.lane.b32.xlu0 %v688_v35, %s1026_s12  ;;  %519 = vrot.lane.b32.xlu1 %v510_v36, %s1025_s10  ;;  %401 = vst.msk [vmem:[%s1156_s11 + $0x4] sm:$0xf] %vm399_vm1, %v892_v46  ;;  %403 = vst.msk [vmem:[%s1156_s11 + $0xc] sm:$0xf] %vm399_vm1, %v894_v47  ;;  %v645_v53 = vmul.f32 %v1139_v25, %v1133_v22  ;;  %v509_v55 = vmul.f32 %v507_v20, %v1141_v27  ;;  %v443_v59 = vsel %vm414_vm2, %v437_v38, 0.0 }
  0xf5   : > { %v511_v56 = vmul.f32 %v507_v20, %v1143_v28  ;;  %v553_v57 = vmul.f32 %v551_v44, %v1141_v27  ;;  %v449_v60 = vsel %vm414_vm2, %v439_v39, 0.0  ;;  %v464_v61 = vmul.f32 %v1137_v23, %v1141_v27 }
  0xf6   : > { %v415_v62 = vsel %vm414_vm2, %v410_v40, 0.0  ;;  %v466_v63 = vmul.f32 %v1137_v23, %v1143_v28  ;;  %v440_v0 = vsel %vm414_vm2, %v436_v41, 0.0  ;;  %v555_v1 = vmul.f32 %v551_v44, %v1143_v28 }
  0xf7   : > { %v446_v2 = vsel %vm414_vm2, %v438_v42, 0.0  ;;  %v598_v3 = vmul.f32 %v1130_v21, %v1141_v27  ;;  %v600_v4 = vmul.f32 %v1130_v21, %v1143_v28  ;;  %v642_v5 = vmul.f32 %v1133_v22, %v1141_v27 }
  0xf8   : > { %523 = vrot.lane.b32.xlu1 %v512_v43, %s1025_s10  ;;  %v687_v8 = vmul.f32 %v1148_v31, %v1141_v27  ;;  %v644_v12 = vmul.f32 %v1133_v22, %v1143_v28  ;;  %v689_v15 = vmul.f32 %v1148_v31, %v1143_v28  ;;  %v690_v17 = vmul.f32 %v1139_v25, %v1148_v31 }
  0xf9   : > { %v421_v24 = vsel %vm414_vm2, %v1173_v45, 0.0 }
  0xfc   : > { %563 = vrot.lane.b32.xlu1 %v554_v48, %s1027_s13 }
 0x100   : > { %567 = vrot.lane.b32.xlu1 %v556_v49, %s1027_s13 }
 0x104   : > { %608 = vrot.lane.b32.xlu1 %v599_v50, %s1027_s13 }
 0x108   : > { %612 = vrot.lane.b32.xlu1 %v601_v51, %s1027_s13 }
 0x10c   : > { %652 = vrot.lane.b32.xlu1 %v643_v52, %s1026_s12 }
 0x110   : > { %656 = vrot.lane.b32.xlu1 %v645_v53, %s1026_s12 }
 0x113   : > { %419 = vadd.xlane.f32.xlu0 %v418_v54 }
 0x129   : > { %517 = vrot.lane.b32.xlu0 %v509_v55, %s1025_s10 }
 0x12d   : > { %521 = vrot.lane.b32.xlu0 %v511_v56, %s1025_s10 }
 0x131   : > { %561 = vrot.lane.b32.xlu0 %v553_v57, %s1027_s13 }
 0x134   : > { %425 = vadd.xlane.f32.xlu1 %v424_v58 }
 0x138   : > { %444 = vadd.xlane.f32.xlu1 %v443_v59 }
 0x13c   : > { %450 = vadd.xlane.f32.xlu1 %v449_v60 }
 0x14d   : > { %472 = vrot.lane.b32.xlu1 %v464_v61, %s1025_s10 }
 0x150   : > { %416 = vadd.xlane.f32.xlu0 %v415_v62 }
 0x151   : > { %476 = vrot.lane.b32.xlu1 %v466_v63, %s1025_s10  ;;  %s747_s10 = sshll.u32 %s1156_s11, 4  ;;  %s1295_s10 = int_to_ptr.vmem [resolvable:$true] %s747_s10 }
 0x152   : > { %p965_p0 = scmp.lt.s32.totalorder %s1295_s10, %s963_s14 }
 0x154   : > { %441 = vadd.xlane.f32.xlu0 %v440_v0 }
 0x155   : > { %565 = vrot.lane.b32.xlu1 %v555_v1, %s1027_s13 }
 0x158   : > { %447 = vadd.xlane.f32.xlu0 %v446_v2 }
 0x159   : > { %606 = vrot.lane.b32.xlu1 %v598_v3, %s1027_s13 }
 0x15d   : > { %610 = vrot.lane.b32.xlu1 %v600_v4, %s1027_s13  ;;  %s958_s13 = scalar_lea.vmem %s1295_s10, 256 }
 0x15e   : > { %p959_p11 = scmp.ne.s32.totalorder %s1295_s10, %s958_s13  ;;  %p966_p1 = scmp.lt.s32.totalorder %s964_s15, %s958_s13 }
 0x160   : > { %p960_p12 = pnand %p959_p11, %p1104_p5  ;;  %p967_p2 = por %p966_p1, %p965_p0 }
 0x161   : > { %650 = vrot.lane.b32.xlu1 %v642_v5, %s1026_s12 }
 0x162   : > { %v475_v6 = vpop.permute.xlu1 %474  ;;  %v479_v9 = vpop.permute.xlu0 %478  ;;  %p961_p13 = pneg %p960_p12 }
 0x163   : > { %v487_v7 = vsel %vm414_vm2, %v475_v6, 0.0  ;;  %v493_v11 = vsel %vm414_vm2, %v479_v9, 0.0 }
 0x164   : > { %488 = vadd.xlane.f32.xlu0 %v487_v7  ;;  %p968_p3 = pnand %p967_p2, %p961_p13 }
 0x165   : > { %695 = vrot.lane.b32.xlu1 %v687_v8, %s1026_s12 }
 0x166   : > { %v520_v10 = vpop.permute.xlu1 %519  ;;  %v698_v29 = vpop.permute.xlu0 %697 }
 0x167   : > { %v532_v26 = vsel %vm414_vm2, %v520_v10, 0.0  ;;  %v710_v30 = vsel %vm414_vm2, %v698_v29, 0.0 }
 0x168   : > { %494 = vadd.xlane.f32.xlu0 %v493_v11 }
 0x169   : > { %654 = vrot.lane.b32.xlu1 %v644_v12, %s1026_s12 }
 0x16a   : > { %v524_v13 = vpop.permute.xlu1 %523 }
 0x16b   : > { %v538_v14 = vsel %vm414_vm2, %v524_v13, 0.0 }
 0x16c   : > { %539 = vadd.xlane.f32.xlu0 %v538_v14 }
 0x16d   : > { %699 = vrot.lane.b32.xlu1 %v689_v15, %s1026_s12 }
 0x16e   : > { %v564_v16 = vpop.permute.xlu1 %563 }
 0x16f   : > { %v576_v25 = vsel %vm414_vm2, %v564_v16, 0.0 }
 0x171   : > { %701 = vrot.lane.b32.xlu1 %v690_v17, %s1026_s12  ;;  %s1299_s12 = scalar_lea.sflag [#allocation3], %s244_s29 }
 0x172   : > { %v568_v18 = vpop.permute.xlu1 %567 }
 0x173   : > { %v582_v19 = vsel %vm414_vm2, %v568_v18, 0.0 }
 0x174   : > { %583 = vadd.xlane.f32.xlu0 %v582_v19 }
 0x176   : > { %v609_v20 = vpop.permute.xlu1 %608 }
 0x177   : > { %v621_v27 = vsel %vm414_vm2, %v609_v20, 0.0 }
 0x17a   : > { %v613_v21 = vpop.permute.xlu1 %612 }
 0x17b   : > { %v627_v28 = vsel %vm414_vm2, %v613_v21, 0.0 }
 0x17e   : > { %v653_v22 = vpop.permute.xlu1 %652 }
 0x17f   : > { %v665_v23 = vsel %vm414_vm2, %v653_v22, 0.0 }
 0x180   : > { %666 = vadd.xlane.f32.xlu0 %v665_v23 }
 0x182   : > { %v657_v31 = vpop.permute.xlu1 %656 }
 0x183   : > { %v671_v1 = vsel %vm414_vm2, %v657_v31, 0.0 }
 0x195   : > { %422 = vadd.xlane.f32.xlu1 %v421_v24 }
 0x199   : > { %533 = vadd.xlane.f32.xlu1 %v532_v26 }
 0x19d   : > { %577 = vadd.xlane.f32.xlu1 %v576_v25 }
 0x1a0   : > { %v420_v34 = vpop.xlane.xlu0 %419 }
 0x1a1   : > { %622 = vadd.xlane.f32.xlu1 %v621_v27  ;;  %429 = vst.msk [vmem:[%s1258_s17 + $0x8] sm:$0xff] %vm427_vm3, %v420_v34 }
 0x1a4   : > { %v518_v36 = vpop.permute.xlu0 %517 }
 0x1a5   : > { %628 = vadd.xlane.f32.xlu1 %v627_v28  ;;  %v529_v43 = vsel %vm414_vm2, %v518_v36, 0.0 }
 0x1a8   : > { %v522_v41 = vpop.permute.xlu0 %521 }
 0x1a9   : > { %711 = vadd.xlane.f32.xlu1 %v710_v30  ;;  %v535_v46 = vsel %vm414_vm2, %v522_v41, 0.0 }
 0x1ac   : > { %v562_v44 = vpop.permute.xlu0 %561 }
 0x1ad   : > { %v573_v50 = vsel %vm414_vm2, %v562_v44, 0.0 }
 0x1c1   : > { %v1248_v32 = vpop.xlane.xlu1 %425 }
 0x1c5   : > { %v445_v33 = vpop.xlane.xlu1 %444 }
 0x1c6   : > { %453 = vst.msk [vmem:[%s1268_s20 + $0x8] sm:$0xff] %vm427_vm3, %v445_v33 }
 0x1c9   : > { %v451_v35 = vpop.xlane.xlu1 %450 }
 0x1ca   : > { %455 = vst.msk [vmem:[%s1268_s20 + $0x18] sm:$0xff] %vm427_vm3, %v451_v35 }
 0x1cd   : > { %v473_v37 = vpop.permute.xlu1 %472 }
 0x1ce   : > { %v484_v38 = vsel %vm414_vm2, %v473_v37, 0.0 }
 0x1cf   : > { %485 = vadd.xlane.f32.xlu1 %v484_v38 }
 0x1d1   : > { %v477_v39 = vpop.permute.xlu1 %476 }
 0x1d2   : > { %v490_v40 = vsel %vm414_vm2, %v477_v39, 0.0 }
 0x1d3   : > { %491 = vadd.xlane.f32.xlu0 %v490_v40 }
 0x1d5   : > { %v566_v42 = vpop.permute.xlu1 %565 }
 0x1d6   : > { %v579_v57 = vsel %vm414_vm2, %v566_v42, 0.0 }
 0x1d7   : > { %530 = vadd.xlane.f32.xlu0 %v529_v43 }
 0x1d9   : > { %v607_v45 = vpop.permute.xlu1 %606 }
 0x1da   : > { %v618_v53 = vsel %vm414_vm2, %v607_v45, 0.0 }
 0x1db   : > { %536 = vadd.xlane.f32.xlu0 %v535_v46 }
 0x1dd   : > { %v611_v47 = vpop.permute.xlu1 %610  ;;  %v417_v48 = vpop.xlane.xlu0 %416 }
 0x1de   : > { %428 = vst.msk [vmem:[%s1258_s17] sm:$0xff] %vm427_vm3, %v417_v48  ;;  %v624_v49 = vsel %vm414_vm2, %v611_v47, 0.0 }
 0x1df   : > { %625 = vadd.xlane.f32.xlu1 %v624_v49  ;;  %574 = vadd.xlane.f32.xlu0 %v573_v50 }
 0x1e1   : > { %v651_v51 = vpop.permute.xlu1 %650  ;;  %v442_v52 = vpop.xlane.xlu0 %441 }
 0x1e2   : > { %452 = vst.msk [vmem:[%s1268_s20] sm:$0xff] %vm427_vm3, %v442_v52  ;;  %v662_v59 = vsel %vm414_vm2, %v651_v51, 0.0 }
 0x1e3   : > { %619 = vadd.xlane.f32.xlu0 %v618_v53 }
 0x1e5   : > { %v696_v54 = vpop.permute.xlu1 %695  ;;  %v448_v55 = vpop.xlane.xlu0 %447 }
 0x1e6   : > { %454 = vst.msk [vmem:[%s1268_s20 + $0x10] sm:$0xff] %vm427_vm3, %v448_v55  ;;  %v707_v56 = vsel %vm414_vm2, %v696_v54, 0.0 }
 0x1e7   : > { %708 = vadd.xlane.f32.xlu1 %v707_v56  ;;  %580 = vadd.xlane.f32.xlu0 %v579_v57 }
 0x1e9   : > { %v655_v58 = vpop.permute.xlu1 %654 }
 0x1ea   : > { %v668_v62 = vsel %vm414_vm2, %v655_v58, 0.0 }
 0x1eb   : > { %663 = vadd.xlane.f32.xlu0 %v662_v59 }
 0x1ed   : > { %v700_v60 = vpop.permute.xlu1 %699 }
 0x1ee   : > { %v713_v61 = vsel %vm414_vm2, %v700_v60, 0.0 }
 0x1ef   : > { %714 = vadd.xlane.f32.xlu1 %v713_v61  ;;  %669 = vadd.xlane.f32.xlu0 %v668_v62 }
 0x1f1   : > { %v702_v63 = vpop.permute.xlu1 %701 }
 0x1f2   : > { %v716_v0 = vsel %vm414_vm2, %v702_v63, 0.0 }
 0x1f3   : > { %717 = vadd.xlane.f32.xlu1 %v716_v0  ;;  %672 = vadd.xlane.f32.xlu0 %v671_v1 }
 0x1f4   : > { %971 = shalt.err (!%p968_p3)
}
 0x1f5   : > { %s972_s29 = scalar_lea.hbm %s1292_s9, 256  ;;  %s976_s19 = scalar_lea.hbm %s1389_s4, 512 }
 0x1f6   : > { %p973_p4 = scmp.ne.s32.totalorder %s1292_s9, %s972_s29  ;;  %p977_p9 = scmp.lt.u32.totalorder %s1292_s9, %s1389_s4 }
 0x1f7   : > { %p978_p10 = scmp.lt.u32.totalorder %s976_s19, %s972_s29  ;;  %p980_p12 = scmp.lt.u32.totalorder %s972_s29, %s1292_s9 }
 0x1f8   : > { %p974_p7 = pnand %p973_p4, %p1104_p5 }
 0x1f9   : > { %p979_p11 = por %p978_p10, %p977_p9 }
 0x1fa   : > { %p975_p8 = pneg %p974_p7 }
 0x1fb   : > { %p981_p13 = por %p980_p12, %p979_p11 }
 0x1fd   : > { %p982_p0 = pnand %p981_p13, %p975_p8 }
 0x1ff   : > { %985 = shalt.err (!%p982_p0)
}
 0x200   : > { %s1029_s28 = smov 64   ;;  %s1030_s13 = smov 4   ;;  %431 = vst.msk [vmem:[%s1258_s17 + $0x18] sm:$0xff] %vm427_vm3, %v1248_v32  ;;  %v489_v5 = vpop.xlane.xlu0 %488  ;;  %vm496_vm4 = vcmask 15368   ;;  %vm585_vm5 = vcmask 23568   ;;  %vm674_vm6 = vcmask 31768  }
 0x201   : > { %911 = dma.vmem_to_hbm [thread:$0]  (%p1104_p5), %s1295_s10, 256, %s1292_s9, %s1299_s12, %s1029_s28, %s1029_s28, %s1030_s13  }
 0x202   : > { %498 = vst.msk [vmem:[%s1258_s17 + $0x8] sm:$0xff] %vm496_vm4, %v489_v5 }
 0x204   : > { %v495_v7 = vpop.xlane.xlu0 %494 }
 0x205   : > { %500 = vst.msk [vmem:[%s1258_s17 + $0x18] sm:$0xff] %vm496_vm4, %v495_v7 }
 0x208   : > { %v540_v9 = vpop.xlane.xlu0 %539 }
 0x209   : > { %544 = vst.msk [vmem:[%s1268_s20 + $0x18] sm:$0xff] %vm496_vm4, %v540_v9 }
 0x20c   : > { %v584_v10 = vpop.xlane.xlu0 %583 }
 0x20d   : > { %589 = vst.msk [vmem:[%s1258_s17 + $0x18] sm:$0xff] %vm585_vm5, %v584_v10 }
 0x210   : > { %v667_v12 = vpop.xlane.xlu0 %666 }
 0x222   : > { %v423_v2 = vpop.xlane.xlu1 %422 }
 0x223   : > { %430 = vst.msk [vmem:[%s1258_s17 + $0x10] sm:$0xff] %vm427_vm3, %v423_v2 }
 0x226   : > { %v534_v3 = vpop.xlane.xlu1 %533 }
 0x227   : > { %542 = vst.msk [vmem:[%s1268_s20 + $0x8] sm:$0xff] %vm496_vm4, %v534_v3 }
 0x22a   : > { %v578_v4 = vpop.xlane.xlu1 %577 }
 0x22b   : > { %587 = vst.msk [vmem:[%s1258_s17 + $0x8] sm:$0xff] %vm585_vm5, %v578_v4 }
 0x22c   : > { %676 = vst.msk [vmem:[%s1258_s17 + $0x8] sm:$0xff] %vm674_vm6, %v667_v12 }
 0x22e   : > { %v623_v6 = vpop.xlane.xlu1 %622 }
 0x22f   : > { %631 = vst.msk [vmem:[%s1268_s20 + $0x8] sm:$0xff] %vm585_vm5, %v623_v6 }
 0x232   : > { %v629_v8 = vpop.xlane.xlu1 %628 }
 0x233   : > { %633 = vst.msk [vmem:[%s1268_s20 + $0x18] sm:$0xff] %vm585_vm5, %v629_v8 }
 0x236   : > { %v712_v11 = vpop.xlane.xlu1 %711 }
 0x237   : > { %720 = vst.msk [vmem:[%s1268_s20 + $0x8] sm:$0xff] %vm674_vm6, %v712_v11 }
 0x25c   : > { %v486_v13 = vpop.xlane.xlu1 %485 }
 0x25d   : > { %497 = vst.msk [vmem:[%s1258_s17] sm:$0xff] %vm496_vm4, %v486_v13 }
 0x260   : > { %v492_v14 = vpop.xlane.xlu0 %491 }
 0x261   : > { %499 = vst.msk [vmem:[%s1258_s17 + $0x10] sm:$0xff] %vm496_vm4, %v492_v14 }
 0x264   : > { %v531_v15 = vpop.xlane.xlu0 %530 }
 0x265   : > { %541 = vst.msk [vmem:[%s1268_s20] sm:$0xff] %vm496_vm4, %v531_v15 }
 0x268   : > { %v537_v16 = vpop.xlane.xlu0 %536 }
 0x269   : > { %543 = vst.msk [vmem:[%s1268_s20 + $0x10] sm:$0xff] %vm496_vm4, %v537_v16 }
 0x26c   : > { %v575_v17 = vpop.xlane.xlu0 %574  ;;  %v626_v18 = vpop.xlane.xlu1 %625 }
 0x26d   : > { %586 = vst.msk [vmem:[%s1258_s17] sm:$0xff] %vm585_vm5, %v575_v17  ;;  %632 = vst.msk [vmem:[%s1268_s20 + $0x10] sm:$0xff] %vm585_vm5, %v626_v18 }
 0x270   : > { %v620_v19 = vpop.xlane.xlu0 %619 }
 0x271   : > { %630 = vst.msk [vmem:[%s1268_s20] sm:$0xff] %vm585_vm5, %v620_v19 }
 0x274   : > { %v709_v20 = vpop.xlane.xlu1 %708  ;;  %v581_v21 = vpop.xlane.xlu0 %580 }
 0x275   : > { %719 = vst.msk [vmem:[%s1268_s20] sm:$0xff] %vm674_vm6, %v709_v20 }
 0x276   : > { %588 = vst.msk [vmem:[%s1258_s17 + $0x10] sm:$0xff] %vm585_vm5, %v581_v21 }
 0x278   : > { %v664_v22 = vpop.xlane.xlu0 %663 }
 0x279   : > { %675 = vst.msk [vmem:[%s1258_s17] sm:$0xff] %vm674_vm6, %v664_v22 }
 0x27c   : > { %v715_v23 = vpop.xlane.xlu1 %714  ;;  %v670_v24 = vpop.xlane.xlu0 %669 }
 0x27d   : > { %721 = vst.msk [vmem:[%s1268_s20 + $0x10] sm:$0xff] %vm674_vm6, %v715_v23  ;;  %677 = vst.msk [vmem:[%s1258_s17 + $0x10] sm:$0xff] %vm674_vm6, %v670_v24 }
 0x280   : > { %v718_v26 = vpop.xlane.xlu1 %717  ;;  %v673_v25 = vpop.xlane.xlu0 %672 }
 0x281   : > { %722 = vst.msk [vmem:[%s1268_s20 + $0x18] sm:$0xff] %vm674_vm6, %v718_v26  ;;  %678 = vst.msk [vmem:[%s1258_s17 + $0x18] sm:$0xff] %vm674_vm6, %v673_v25 }
 0x282 PF: > { %p917_p5 = scmp.ge.s32.totalorder %s1020_s24, 2  ;;  %s770_s7 = sand.u32 1, %s1008_s21  }
 0x283   : > { %s771_s9 = scalar_lea.sflag [#allocation3], %s770_s7 }
 0x284   : > { %p914_p1 = pnand %p917_p5, %p1108_p6 }
 0x286   : > { %1003 = dma.done.wait (!%p914_p1), %s771_s9, 256  }
 0x287   : > { %1005 = vsyncadd (!%p914_p1), %s771_s9, 4294967040  ;;  %p17_p2 = scmp.ge.s32.totalorder %s1091_s27, 4   ;;  %s1394_s21 = smov %s1012_s22 }
 0x288   : > { %s1395_s22 = smov %s1016_s23  ;;  %s1396_s23 = smov %s1102_s30 }
 0x289   : > { %s1397_s24 = smov %s1091_s27  ;;  %19 = sbr.rel (!%p17_p2) target bundleno = 3 (0x3), region = 95 }
 0x290   :  { %792 = vsyncpa [#allocation3], 1 }
 0x291   :  { %794 = vsyncpa [#allocation3 + $0x1], 1 }

</bundles_post_ra>
